<compile_context>
chip_gen: v7x
topology: tpu7x:2x2x1
jax: 0.10.0
libtpu: 0.0.40
codegen_flags: <defaults>
</compile_context>

<pallas_src>
import jax
import jax.numpy as jnp
from jax.experimental import pallas as pl
from jax.experimental.pallas import tpu as pltpu

FEAT_DIM = 1024  # fc = nn.Linear(1024, 1) implies 1024-d feature maps


# ---------------------------------------------------------------------------
# VMEM budgeting / tile selection
# ---------------------------------------------------------------------------
def _vmem_budget_bytes():
    """Per-generation VMEM budget (v7x: 64 MiB physical; v5e/v6e: 128 MiB)."""
    try:
        cap = int(pltpu.get_tpu_info().vmem_capacity_bytes)
    except Exception:
        cap = None
    if cap is None:
        return 48 * 1024 * 1024          # safe everywhere (incl. v7x)
    if cap >= 100 * 1024 * 1024:
        return 96 * 1024 * 1024          # v5e / v6e: 128 MiB physical
    return min(48 * 1024 * 1024, max(cap - 16 * 1024 * 1024, 32 * 1024 * 1024))


def _choose_tile(HW, bytes_per_col, stream_budget, cap):
    """Largest spatial tile (lanes) that fits the streaming VMEM budget."""
    tile_max = max(128, stream_budget // max(1, bytes_per_col))
    if cap is not None:
        tile_max = min(tile_max, int(cap))
    if tile_max >= HW:
        return HW                         # whole spatial extent per grid step
    t = max(128, (tile_max // 128) * 128)
    # Prefer a multiple-of-128 divisor of HW (avoids a ragged masked tail),
    # but only if it is not much smaller than the budget-limited tile.
    d = t
    while d >= 128:
        if HW % d == 0:
            if 2 * d >= t:
                return d
            break
        d -= 128
    return t


# ---------------------------------------------------------------------------
# Fused kernel
# ---------------------------------------------------------------------------
def _make_kernel(HW, tile, Bg, ragged):
    """Build the fused kernel (all arguments are static Python values)."""
    inv_hw = 1.0 / float(HW)

    def kernel(xl_ref, xg_ref, wreg_ref, breg_ref, wglo_ref, bglo_ref,
               sel_ref, wfc_ref, bfc_ref, o_ref, acc_l_ref, acc_g_ref):
        k = pl.program_id(1)                     # spatial (reduction) axis

        # ---- init GAP accumulators on the first spatial tile ---------------
        @pl.when(k == 0)
        def _init():
            acc_l_ref[...] = jnp.zeros_like(acc_l_ref)
            acc_g_ref[...] = jnp.zeros_like(acc_g_ref)

        # ---- streaming global-average-pool partial sums (f32 accumulate) ---
        xl = xl_ref[...]                         # (rows_g, tile), native dtype
        xg = xg_ref[...]
        if ragged:
            # Pallas does not zero-fill out-of-bounds block reads: mask the
            # columns past the true spatial extent on the last tile.
            col = k * tile + jax.lax.broadcasted_iota(jnp.int32, xl.shape, 1)
            valid = col < HW
            xl = jnp.where(valid, xl, 0.0)
            xg = jnp.where(valid, xg, 0.0)
        acc_l_ref[...] += jnp.sum(xl.astype(jnp.float32), axis=-1, keepdims=True)
        acc_g_ref[...] += jnp.sum(xg.astype(jnp.float32), axis=-1, keepdims=True)

        # ---- epilogue on the last tile: projection + fusion + fc -----------
        @pl.when(k == pl.num_programs(1) - 1)
        def _finalize():
            means_l = acc_l_ref[...] * inv_hw            # (rows_g, 1)
            means_g = acc_g_ref[...] * inv_hw
            # C -> FEAT projection (batched over all rows at once): broadcast
            # multiply against the per-row expanded weights ...
            contrib_l = means_l * wreg_ref[...]          # (rows_g, FEAT)
            contrib_g = means_g * wglo_ref[...]          # (rows_g, FEAT)
            # ... then sum the C rows belonging to each batch element.
            if Bg == 1:
                L = breg_ref[...] + jnp.sum(contrib_l, axis=0, keepdims=True)
                G = bglo_ref[...] + jnp.sum(contrib_g, axis=0, keepdims=True)
            else:
                sel = sel_ref[...]                       # (Bg, rows_g) 0/1 map
                L = breg_ref[...] + jnp.dot(sel, contrib_l,
                                            preferred_element_type=jnp.float32)
                G = bglo_ref[...] + jnp.dot(sel, contrib_g,
                                            preferred_element_type=jnp.float32)
            # Enhance_models.forward fusion math, batched over (Bg, FEAT).
            w1 = jax.nn.sigmoid(L * G)
            GL_map = (w1 + 1.0) * G
            a = GL_map + L
            c = GL_map + G
            W2 = jax.nn.sigmoid(a * c)
            GL = W2 * (a + c)                            # == W2*a + W2*c
            # fc (1024 -> 1): lane reduction; dropout(0.15) eval == identity.
            out = jnp.sum(GL * wfc_ref[...], axis=-1, keepdims=True) + bfc_ref[...]
            o_ref[...] = out                             # single (Bg, 1) store

    return kernel


# ---------------------------------------------------------------------------
# Wrapper
# ---------------------------------------------------------------------------
def enhance_forward(golbal_img, local_img, params, *, hw_tile=None,
                    batch_split=None):
    """Fused Enhance_models forward.  Images are NCHW [B, C, H, W]."""
    B, C, H, W = local_img.shape
    assert golbal_img.shape == local_img.shape
    HW = H * W
    feat_dim = params["w_reg"].shape[1]

    # --- batch-parallel grouping (megacore on v7x; harmless elsewhere) ------
    if batch_split is None:
        n_groups = 2 if (B % 2 == 0 and B >= 2) else 1
    else:
        n_groups = batch_split if (batch_split >= 1 and B % batch_split == 0) else 1
    Bg = B // n_groups
    rows_g = Bg * C

    # --- zero-copy reshapes, native dtype (no bf16 cast, no jnp.pad) --------
    xl = local_img.reshape(n_groups, rows_g, HW)
    xg = golbal_img.reshape(n_groups, rows_g, HW)
    itemsize = jnp.dtype(xl.dtype).itemsize

    # --- VMEM budgeting & spatial tile ---------------------------------------
    budget = _vmem_budget_bytes()
    fixed = 2 * 4 * (2 * rows_g * feat_dim + 3 * feat_dim + Bg * rows_g + 1)
    stream_budget = max(budget - fixed - 6 * 1024 * 1024, 2 * 1024 * 1024)
    # per lane-column: 2 inputs x (2 pipeline buffers + f32/mask temps).
    bytes_per_col = 2 * rows_g * (2 * itemsize + 8)
    tile = _choose_tile(HW, bytes_per_col, stream_budget, hw_tile)
    num_tiles = -(-HW // tile)
    ragged = (HW % tile) != 0

    # --- parameters (resident, tiny) -----------------------------------------
    f32 = jnp.float32
    w_reg_exp = jnp.tile(params["w_reg"].astype(f32), (Bg, 1))   # (rows_g, FEAT)
    w_glo_exp = jnp.tile(params["w_glo"].astype(f32), (Bg, 1))   # (rows_g, FEAT)
    b_reg = params["b_reg"].astype(f32)                          # (1, FEAT)
    b_glo = params["b_glo"].astype(f32)                          # (1, FEAT)
    w_fc_t = params["w_fc"].astype(f32).T                        # (1, FEAT)
    b_fc = params["b_fc"].astype(f32)                            # (1, 1)
    # group-sum selector: sel[b, b*C + c] = 1
    sel = jnp.kron(jnp.eye(Bg, dtype=f32), jnp.ones((1, C), dtype=f32))

    grid_spec = pltpu.PrefetchScalarGridSpec(
        num_scalar_prefetch=0,
        grid=(n_groups, num_tiles),            # (batch-parallel, spatial-reduce)
        in_specs=[
            pl.BlockSpec((None, rows_g, tile), lambda g, k: (g, 0, k)),   # local
            pl.BlockSpec((None, rows_g, tile), lambda g, k: (g, 0, k)),   # global
            pl.BlockSpec((rows_g, feat_dim), lambda g, k: (0, 0)),        # w_reg
            pl.BlockSpec((1, feat_dim), lambda g, k: (0, 0)),             # b_reg
            pl.BlockSpec((rows_g, feat_dim), lambda g, k: (0, 0)),        # w_glo
            pl.BlockSpec((1, feat_dim), lambda g, k: (0, 0)),             # b_glo
            pl.BlockSpec((Bg, rows_g), lambda g, k: (0, 0)),              # sel
            pl.BlockSpec((1, feat_dim), lambda g, k: (0, 0)),             # w_fc^T
            pl.BlockSpec((1, 1), lambda g, k: (0, 0)),                    # b_fc
        ],
        out_specs=pl.BlockSpec((None, Bg, 1), lambda g, k: (g, 0, 0)),
        scratch_shapes=[
            pltpu.VMEM((rows_g, 1), jnp.float32),   # local GAP accumulator
            pltpu.VMEM((rows_g, 1), jnp.float32),   # global GAP accumulator
        ],
    )

    out3d = pl.pallas_call(
        _make_kernel(HW, tile, Bg, ragged),
        out_shape=jax.ShapeDtypeStruct((n_groups, Bg, 1), jnp.float32),
        grid_spec=grid_spec,
        compiler_params=pltpu.CompilerParams(
            dimension_semantics=("parallel", "arbitrary"),
            vmem_limit_bytes=budget,
        ),
    )(xl, xg, w_reg_exp, b_reg, w_glo_exp, b_glo, sel, w_fc_t, b_fc)

    return out3d.reshape(B, 1)


# ---------------------------------------------------------------------------
# Pure-JAX reference (correctness check).
# ---------------------------------------------------------------------------
def reference_forward(golbal_img, local_img, params):
    def bb(x, w, b):
        B, C, H, W = x.shape
        feat = jnp.mean(x.reshape(B, C, H * W).astype(jnp.float32), axis=-1)
        return feat @ w.astype(jnp.float32) + b.astype(jnp.float32)

    L = bb(local_img, params["w_reg"], params["b_reg"])
    G = bb(golbal_img, params["w_glo"], params["b_glo"])
    w1 = jax.nn.sigmoid(L * G)
    GL_map = (w1 + 1.0) * G
    W2 = jax.nn.sigmoid((GL_map + L) * (GL_map + G))
    GL = W2 * (GL_map + L) + W2 * (GL_map + G)
    return GL @ params["w_fc"].astype(jnp.float32) + params["b_fc"].astype(jnp.float32)


if __name__ == "__main__":
    B, C, H, W = 2, 4, 16, 16
    key = jax.random.PRNGKey(0)
    k_g, k_l, k1, k2, k3, k4, k5 = jax.random.split(key, 7)

    golbal_img = jax.random.normal(k_g, (B, C, H, W), jnp.float32)
    local_img = jax.random.normal(k_l, (B, C, H, W), jnp.float32)

    params = {
        "w_reg": jax.random.normal(k1, (C, FEAT_DIM), dtype=jnp.float32) * 0.1,
        "b_reg": jax.random.normal(k2, (1, FEAT_DIM), dtype=jnp.float32) * 0.01,
        "w_glo": jax.random.normal(k3, (C, FEAT_DIM), dtype=jnp.float32) * 0.1,
        "b_glo": jax.random.normal(k4, (1, FEAT_DIM), dtype=jnp.float32) * 0.01,
        "w_fc": jax.random.normal(k5, (FEAT_DIM, 1), dtype=jnp.float32) * 0.02,
        "b_fc": jnp.zeros((1, 1), dtype=jnp.float32),
    }

    ref = reference_forward(golbal_img, local_img, params)

    # 1) default config: whole-image tile, batch split across two grid groups.
    out = jax.block_until_ready(enhance_forward(golbal_img, local_img, params))
    assert out.shape == (B, 1)
    assert jnp.allclose(out, ref, atol=5e-4, rtol=5e-4), (out, ref)

    # 2) multi-tile streaming + single group (exercises the accumulate path
    #    and the Bg>1 group-sum dot in the epilogue).
    out2 = jax.block_until_ready(
        enhance_forward(golbal_img, local_img, params, hw_tile=128, batch_split=1))
    assert jnp.allclose(out2, ref, atol=5e-4, rtol=5e-4), (out2, ref)

    # 3) ragged spatial extent (HW not a multiple of the tile) -> masked tail.
    Hr, Wr = 18, 18
    g2 = jax.random.normal(k_g, (B, C, Hr, Wr), jnp.float32)
    l2 = jax.random.normal(k_l, (B, C, Hr, Wr), jnp.float32)
    ref2 = reference_forward(g2, l2, params)
    out3 = jax.block_until_ready(enhance_forward(g2, l2, params, hw_tile=128))
    assert jnp.allclose(out3, ref2, atol=5e-4, rtol=5e-4), (out3, ref2)

    print("KERNEL_OK")
</pallas_src>

<mosaic_0001>
module attributes {stable_mosaic.version = 11 : i64} {
  func.func @kernel(%arg0: i32, %arg1: i32, %arg2: memref<1x4x256xf32, #tpu.memory_space<vmem>>, %arg3: memref<1x4x256xf32, #tpu.memory_space<vmem>>, %arg4: memref<4x1024xf32, #tpu.memory_space<vmem>>, %arg5: memref<1x1024xf32, #tpu.memory_space<vmem>>, %arg6: memref<4x1024xf32, #tpu.memory_space<vmem>>, %arg7: memref<1x1024xf32, #tpu.memory_space<vmem>>, %arg8: memref<1x4xf32, #tpu.memory_space<vmem>>, %arg9: memref<1x1024xf32, #tpu.memory_space<vmem>>, %arg10: memref<1x1xf32, #tpu.memory_space<vmem>>, %arg11: memref<1x1x1xf32, #tpu.memory_space<vmem>>, %arg12: memref<4x1xf32, #tpu.memory_space<vmem>>, %arg13: memref<4x1xf32, #tpu.memory_space<vmem>>) attributes {dimension_semantics = [#tpu.dimension_semantics<parallel>, #tpu.dimension_semantics<arbitrary>], iteration_bounds = array<i64: 2, 1>, scalar_prefetch = 0 : i64, scratch_operands = 2 : i64, tpu.core_type = #tpu.core_type<tc>, window_params = [{transform_indices = @transform_0, window_bounds = array<i64: 1, 4, 256>}, {transform_indices = @transform_1, window_bounds = array<i64: 1, 4, 256>}, {pipeline_mode = #tpu.pipeline_mode<synchronous>, transform_indices = @transform_2, window_bounds = array<i64: 4, 1024>}, {pipeline_mode = #tpu.pipeline_mode<synchronous>, transform_indices = @transform_3, window_bounds = array<i64: 1, 1024>}, {pipeline_mode = #tpu.pipeline_mode<synchronous>, transform_indices = @transform_4, window_bounds = array<i64: 4, 1024>}, {pipeline_mode = #tpu.pipeline_mode<synchronous>, transform_indices = @transform_5, window_bounds = array<i64: 1, 1024>}, {pipeline_mode = #tpu.pipeline_mode<synchronous>, transform_indices = @transform_6, window_bounds = array<i64: 1, 4>}, {pipeline_mode = #tpu.pipeline_mode<synchronous>, transform_indices = @transform_7, window_bounds = array<i64: 1, 1024>}, {pipeline_mode = #tpu.pipeline_mode<synchronous>, transform_indices = @transform_8, window_bounds = array<i64: 1, 1>}, {transform_indices = @transform_9, window_bounds = array<i64: 1, 1, 1>}]} {
    %c0_i32 = arith.constant 0 : i32
    %0 = arith.cmpi eq, %arg1, %c0_i32 : i32
    %1 = arith.extui %0 : i1 to i32
    %c0_i32_0 = arith.constant 0 : i32
    %2 = arith.cmpi ne, %1, %c0_i32_0 : i32
    scf.if %2 {
      %cst_17 = arith.constant 0.000000e+00 : f32
      %20 = vector.broadcast %cst_17 : f32 to vector<4x1xf32>
      %c0_18 = arith.constant 0 : index
      %c0_19 = arith.constant 0 : index
      %21 = vector.load %arg12[%c0_18, %c0_19] : memref<4x1xf32, #tpu.memory_space<vmem>>, vector<4x1xf32>
      tpu.vector_store %arg12[%c0_18, %c0_19], %20 {strides = array<i32>} : memref<4x1xf32, #tpu.memory_space<vmem>>, vector<4x1xf32>,
      %cst_20 = arith.constant 0.000000e+00 : f32
      %22 = vector.broadcast %cst_20 : f32 to vector<4x1xf32>
      %c0_21 = arith.constant 0 : index
      %c0_22 = arith.constant 0 : index
      %23 = vector.load %arg13[%c0_21, %c0_22] : memref<4x1xf32, #tpu.memory_space<vmem>>, vector<4x1xf32>
      tpu.vector_store %arg13[%c0_21, %c0_22], %22 {strides = array<i32>} : memref<4x1xf32, #tpu.memory_space<vmem>>, vector<4x1xf32>,
    } else {
    }
    %c0 = arith.constant 0 : index
    %c0_1 = arith.constant 0 : index
    %c0_2 = arith.constant 0 : index
    %3 = vector.load %arg2[%c0, %c0_1, %c0_2] : memref<1x4x256xf32, #tpu.memory_space<vmem>>, vector<1x4x256xf32>
    %4 = vector.shape_cast %3 : vector<1x4x256xf32> to vector<4x256xf32>
    %c0_3 = arith.constant 0 : index
    %c0_4 = arith.constant 0 : index
    %c0_5 = arith.constant 0 : index
    %5 = vector.load %arg3[%c0_3, %c0_4, %c0_5] : memref<1x4x256xf32, #tpu.memory_space<vmem>>, vector<1x4x256xf32>
    %6 = vector.shape_cast %5 : vector<1x4x256xf32> to vector<4x256xf32>
    %c0_6 = arith.constant 0 : index
    %c0_7 = arith.constant 0 : index
    %7 = vector.load %arg12[%c0_6, %c0_7] : memref<4x1xf32, #tpu.memory_space<vmem>>, vector<4x1xf32>
    %cst = arith.constant dense<0.000000e+00> : vector<4xf32>
    %8 = vector.multi_reduction <add>, %4, %cst [1] : vector<4x256xf32> to vector<4xf32>
    %9 = vector.shape_cast %8 : vector<4xf32> to vector<4x1xf32>
    %10 = arith.addf %7, %9 : vector<4x1xf32>
    %c0_8 = arith.constant 0 : index
    %c0_9 = arith.constant 0 : index
    %11 = vector.load %arg12[%c0_8, %c0_9] : memref<4x1xf32, #tpu.memory_space<vmem>>, vector<4x1xf32>
    tpu.vector_store %arg12[%c0_8, %c0_9], %10 {strides = array<i32>} : memref<4x1xf32, #tpu.memory_space<vmem>>, vector<4x1xf32>,
    %c0_10 = arith.constant 0 : index
    %c0_11 = arith.constant 0 : index
    %12 = vector.load %arg13[%c0_10, %c0_11] : memref<4x1xf32, #tpu.memory_space<vmem>>, vector<4x1xf32>
    %cst_12 = arith.constant dense<0.000000e+00> : vector<4xf32>
    %13 = vector.multi_reduction <add>, %6, %cst_12 [1] : vector<4x256xf32> to vector<4xf32>
    %14 = vector.shape_cast %13 : vector<4xf32> to vector<4x1xf32>
    %15 = arith.addf %12, %14 : vector<4x1xf32>
    %c0_13 = arith.constant 0 : index
    %c0_14 = arith.constant 0 : index
    %16 = vector.load %arg13[%c0_13, %c0_14] : memref<4x1xf32, #tpu.memory_space<vmem>>, vector<4x1xf32>
    tpu.vector_store %arg13[%c0_13, %c0_14], %15 {strides = array<i32>} : memref<4x1xf32, #tpu.memory_space<vmem>>, vector<4x1xf32>,
    %c0_i32_15 = arith.constant 0 : i32
    %17 = arith.cmpi eq, %arg1, %c0_i32_15 : i32
    %18 = arith.extui %17 : i1 to i32
    %c0_i32_16 = arith.constant 0 : i32
    %19 = arith.cmpi ne, %18, %c0_i32_16 : i32
    scf.if %19 {
      %c0_17 = arith.constant 0 : index
      %c0_18 = arith.constant 0 : index
      %20 = vector.load %arg12[%c0_17, %c0_18] : memref<4x1xf32, #tpu.memory_space<vmem>>, vector<4x1xf32>
      %cst_19 = arith.constant 3.906250e-03 : f32
      %21 = vector.broadcast %cst_19 : f32 to vector<4x1xf32>
      %22 = arith.mulf %20, %21 : vector<4x1xf32>
      %c0_20 = arith.constant 0 : index
      %c0_21 = arith.constant 0 : index
      %23 = vector.load %arg13[%c0_20, %c0_21] : memref<4x1xf32, #tpu.memory_space<vmem>>, vector<4x1xf32>
      %cst_22 = arith.constant 3.906250e-03 : f32
      %24 = vector.broadcast %cst_22 : f32 to vector<4x1xf32>
      %25 = arith.mulf %23, %24 : vector<4x1xf32>
      %c0_23 = arith.constant 0 : index
      %c0_24 = arith.constant 0 : index
      %26 = vector.load %arg4[%c0_23, %c0_24] : memref<4x1024xf32, #tpu.memory_space<vmem>>, vector<4x1024xf32>
      %27 = vector.broadcast %22 : vector<4x1xf32> to vector<4x1024xf32>
      %28 = arith.mulf %27, %26 : vector<4x1024xf32>
      %c0_25 = arith.constant 0 : index
      %c0_26 = arith.constant 0 : index
      %29 = vector.load %arg6[%c0_25, %c0_26] : memref<4x1024xf32, #tpu.memory_space<vmem>>, vector<4x1024xf32>
      %30 = vector.broadcast %25 : vector<4x1xf32> to vector<4x1024xf32>
      %31 = arith.mulf %30, %29 : vector<4x1024xf32>
      %c0_27 = arith.constant 0 : index
      %c0_28 = arith.constant 0 : index
      %32 = vector.load %arg5[%c0_27, %c0_28] : memref<1x1024xf32, #tpu.memory_space<vmem>>, vector<1x1024xf32>
      %cst_29 = arith.constant dense<0.000000e+00> : vector<1024xf32>
      %33 = vector.multi_reduction <add>, %28, %cst_29 [0] : vector<4x1024xf32> to vector<1024xf32>
      %34 = vector.shape_cast %33 : vector<1024xf32> to vector<1x1024xf32>
      %35 = arith.addf %32, %34 : vector<1x1024xf32>
      %c0_30 = arith.constant 0 : index
      %c0_31 = arith.constant 0 : index
      %36 = vector.load %arg7[%c0_30, %c0_31] : memref<1x1024xf32, #tpu.memory_space<vmem>>, vector<1x1024xf32>
      %cst_32 = arith.constant dense<0.000000e+00> : vector<1024xf32>
      %37 = vector.multi_reduction <add>, %31, %cst_32 [0] : vector<4x1024xf32> to vector<1024xf32>
      %38 = vector.shape_cast %37 : vector<1024xf32> to vector<1x1024xf32>
      %39 = arith.addf %36, %38 : vector<1x1024xf32>
      %40 = arith.mulf %35, %39 : vector<1x1024xf32>
      %41 = arith.negf %40 : vector<1x1024xf32>
      %42 = math.exp %41 : vector<1x1024xf32>
      %cst_33 = arith.constant 1.000000e+00 : f32
      %43 = vector.broadcast %cst_33 : f32 to vector<1x1024xf32>
      %44 = arith.addf %43, %42 : vector<1x1024xf32>
      %45 = arith.divf %43, %44 : vector<1x1024xf32>
      %cst_34 = arith.constant 1.000000e+00 : f32
      %46 = vector.broadcast %cst_34 : f32 to vector<1x1024xf32>
      %47 = arith.addf %45, %46 : vector<1x1024xf32>
      %48 = arith.mulf %47, %39 : vector<1x1024xf32>
      %49 = arith.addf %48, %35 : vector<1x1024xf32>
      %50 = arith.addf %48, %39 : vector<1x1024xf32>
      %51 = arith.mulf %49, %50 : vector<1x1024xf32>
      %52 = arith.negf %51 : vector<1x1024xf32>
      %53 = math.exp %52 : vector<1x1024xf32>
      %cst_35 = arith.constant 1.000000e+00 : f32
      %54 = vector.broadcast %cst_35 : f32 to vector<1x1024xf32>
      %55 = arith.addf %54, %53 : vector<1x1024xf32>
      %56 = arith.divf %54, %55 : vector<1x1024xf32>
      %57 = arith.addf %49, %50 : vector<1x1024xf32>
      %58 = arith.mulf %56, %57 : vector<1x1024xf32>
      %c0_36 = arith.constant 0 : index
      %c0_37 = arith.constant 0 : index
      %59 = vector.load %arg9[%c0_36, %c0_37] : memref<1x1024xf32, #tpu.memory_space<vmem>>, vector<1x1024xf32>
      %60 = arith.mulf %58, %59 : vector<1x1024xf32>
      %cst_38 = arith.constant dense<0.000000e+00> : vector<1xf32>
      %61 = vector.multi_reduction <add>, %60, %cst_38 [1] : vector<1x1024xf32> to vector<1xf32>
      %62 = vector.shape_cast %61 : vector<1xf32> to vector<1x1xf32>
      %c0_39 = arith.constant 0 : index
      %c0_40 = arith.constant 0 : index
      %63 = vector.load %arg10[%c0_39, %c0_40] : memref<1x1xf32, #tpu.memory_space<vmem>>, vector<1x1xf32>
      %64 = arith.addf %62, %63 : vector<1x1xf32>
      %c0_41 = arith.constant 0 : index
      %c0_42 = arith.constant 0 : index
      %c0_43 = arith.constant 0 : index
      %65 = vector.load %arg11[%c0_41, %c0_42, %c0_43] : memref<1x1x1xf32, #tpu.memory_space<vmem>>, vector<1x1x1xf32>
      %66 = vector.shape_cast %65 : vector<1x1x1xf32> to vector<1x1xf32>
      %67 = vector.shape_cast %64 : vector<1x1xf32> to vector<1x1x1xf32>
      tpu.vector_store %arg11[%c0_41, %c0_42, %c0_43], %67 {strides = array<i32>} : memref<1x1x1xf32, #tpu.memory_space<vmem>>, vector<1x1x1xf32>,
    } else {
    }
    return
  }
  func.func @transform_0(%arg0: i32, %arg1: i32) -> (i32, i32, i32) {
    %c0_i32 = arith.constant 0 : i32
    %c0_i32_0 = arith.constant 0 : i32
    return %arg0, %c0_i32, %arg1 : i32, i32, i32
  }
  func.func @transform_1(%arg0: i32, %arg1: i32) -> (i32, i32, i32) {
    %c0_i32 = arith.constant 0 : i32
    %c0_i32_0 = arith.constant 0 : i32
    return %arg0, %c0_i32, %arg1 : i32, i32, i32
  }
  func.func @transform_2(%arg0: i32, %arg1: i32) -> (i32, i32) {
    %c0_i32 = arith.constant 0 : i32
    %c0_i32_0 = arith.constant 0 : i32
    %c0_i32_1 = arith.constant 0 : i32
    return %c0_i32, %c0_i32_0 : i32, i32
  }
  func.func @transform_3(%arg0: i32, %arg1: i32) -> (i32, i32) {
    %c0_i32 = arith.constant 0 : i32
    %c0_i32_0 = arith.constant 0 : i32
    %c0_i32_1 = arith.constant 0 : i32
    return %c0_i32, %c0_i32_0 : i32, i32
  }
  func.func @transform_4(%arg0: i32, %arg1: i32) -> (i32, i32) {
    %c0_i32 = arith.constant 0 : i32
    %c0_i32_0 = arith.constant 0 : i32
    %c0_i32_1 = arith.constant 0 : i32
    return %c0_i32, %c0_i32_0 : i32, i32
  }
  func.func @transform_5(%arg0: i32, %arg1: i32) -> (i32, i32) {
    %c0_i32 = arith.constant 0 : i32
    %c0_i32_0 = arith.constant 0 : i32
    %c0_i32_1 = arith.constant 0 : i32
    return %c0_i32, %c0_i32_0 : i32, i32
  }
  func.func @transform_6(%arg0: i32, %arg1: i32) -> (i32, i32) {
    %c0_i32 = arith.constant 0 : i32
    %c0_i32_0 = arith.constant 0 : i32
    %c0_i32_1 = arith.constant 0 : i32
    return %c0_i32, %c0_i32_0 : i32, i32
  }
  func.func @transform_7(%arg0: i32, %arg1: i32) -> (i32, i32) {
    %c0_i32 = arith.constant 0 : i32
    %c0_i32_0 = arith.constant 0 : i32
    %c0_i32_1 = arith.constant 0 : i32
    return %c0_i32, %c0_i32_0 : i32, i32
  }
  func.func @transform_8(%arg0: i32, %arg1: i32) -> (i32, i32) {
    %c0_i32 = arith.constant 0 : i32
    %c0_i32_0 = arith.constant 0 : i32
    %c0_i32_1 = arith.constant 0 : i32
    return %c0_i32, %c0_i32_0 : i32, i32
  }
  func.func @transform_9(%arg0: i32, %arg1: i32) -> (i32, i32, i32) {
    %c0_i32 = arith.constant 0 : i32
    %c0_i32_0 = arith.constant 0 : i32
    %c0_i32_1 = arith.constant 0 : i32
    return %arg0, %c0_i32, %c0_i32_0 : i32, i32, i32
  }
}

</mosaic_0001>

<bundles_post_ra>
// kernel: tpu_custom_call.1
= control target key start
LH: loop header
LB: loop body
LE: loop exit
PB: predicated region body
PF: predicated region fallthrough
CT: control target
= control target key end

     0   :  { %s1636_s0 = inlined_call_operand.hbm [shape: f32[2,4,256], index: 0, kind: input, shape index: {}]   ;;  %s1637_s1 = inlined_call_operand.hbm [shape: f32[2,4,256], index: 1, kind: input, shape index: {}]   ;;  %s1638_s2 = inlined_call_operand.hbm [shape: f32[4,1024], index: 2, kind: input, shape index: {}]   ;;  %s1639_s3 = inlined_call_operand.vmem [shape: f32[1,1024], index: 3, kind: input, shape index: {}]   ;;  %s1640_s4 = inlined_call_operand.hbm [shape: f32[4,1024], index: 4, kind: input, shape index: {}]   ;;  %s1641_s5 = inlined_call_operand.vmem [shape: f32[1,1024], index: 5, kind: input, shape index: {}]   ;;  %s1642_s6 = inlined_call_operand.vmem [shape: f32[1,4], index: 6, kind: input, shape index: {}]   ;;  %s1643_s7 = inlined_call_operand.vmem [shape: f32[1,1024], index: 7, kind: input, shape index: {}]   ;;  %s1644_s8 = inlined_call_operand.<no memory space> [shape: f32[1,1], index: 8, kind: input, shape index: {}]   ;;  %s1645_s9 = inlined_call_operand.vmem [shape: f32[2,1,1], index: 9, kind: output, shape index: {}]  }
   0x1   :  { %1652 = sst [smem:[#allocation17_spill]] %s1638_s2  ;;  %v14_v0 = vstv %s1644_s8 }
   0x2   :  { %1653 = sst [smem:[#allocation18_spill]] %s1640_s4  ;;  %15 = vst [vmem:[#allocation4] sm:$0x1] %v14_v0 }
   0x3   :  { %16 = vsyncpa [#allocation6], 0 }
   0x4   :  { %18 = vsyncpa [#allocation6 + $0x1], 0 }
   0x5   :  { %19 = vsyncpa [#allocation8], 0 }
   0x6   :  { %21 = vsyncpa [#allocation8 + $0x1], 0 }
   0x7   :  { %22 = vsyncpa [#allocation11], 0  ;;  %s1331_s6 = smov 0   ;;  %s1333_s11 = smov 0  }
   0x8   :  { %s1335_s12 = smov 0   ;;  %s1337_s13 = smov 0  }
   0x9   :  { %s1339_s14 = smov 0   ;;  %s1341_s15 = smov 0  }
   0xa LB: > { %s1650_s8 = sadd.s32 4294967295, %s1269_s15   ;;  %p62_p0 = scmp.ne.s32.totalorder %s1253_s11, %s1249_s6  ;;  %s1269_s15 = sphi %s1341_s15, %s28_s15   ;;  %s1265_s14 = sphi %s1339_s14, %s1671_s14   ;;  %s1261_s13 = sphi %s1337_s13, %s1670_s13   ;;  %s1257_s12 = sphi %s1335_s12, %s1669_s12   ;;  %s1253_s11 = sphi %s1333_s11, %s1668_s11   ;;  %s1249_s6 = sphi %s1331_s6, %s1667_s6  }
   0xb   : > { %p1363_p1 = scmp.eq.s32.totalorder %s1650_s8, 0  ;;  %p966_p2 = scmp.ge.s32.totalorder %s1269_s15, 1 }
   0xc   : > { %p274_p3 = scmp.lt.s32.totalorder %s1269_s15, 3  ;;  %s1271_s19 = smov [#allocation9]  }
   0xd   : > { %s1654_s16 = scalar_select %p1363_p1, 1, 0 }
   0xe   : > { %p1371_p4 = por %p1363_p1, %p62_p0  ;;  %p1375_p5 = pnand %p966_p2, %p274_p3 }
   0xf   : > { %s287_s20 = sshll.u32 %s1271_s19, 4  ;;  %s1272_s21 = smov [#allocation10]   ;;  %s288_s20 = int_to_ptr.vmem [resolvable:$true] %s287_s20 }
  0x10   : > { %s1655_s17 = scalar_select %p1371_p4, 1, 0 }
  0x11   : > { %s1656_s18 = scalar_select %p1375_p5, 1, 0 }
  0x12   : > { %p999_p6 = pneg %p1375_p5  ;;  %s301_s22 = sshll.u32 %s1272_s21, 4  ;;  %s1387_s22 = int_to_ptr.vmem [resolvable:$true] %s301_s22 }
  0x13   : > { %s1658_s2 = sld [smem:[#allocation17_spill]] }
  0x14   : > { %p1383_p7 = pnand %p999_p6, %p1363_p1 }
  0x16   : > { %p1093_p9 = pneg %p1383_p7 }
  0x19   : > { %s1091_s26 = scalar_lea.hbm %s1658_s2, 512 }
  0x1a   : > { %p1092_p8 = scmp.ne.s32.totalorder %s1658_s2, %s1091_s26  ;;  %p1098_p12 = scmp.lt.u32.totalorder %s1091_s26, %s1658_s2 }
  0x1c   : > { %p1094_p10 = pnand %p1093_p9, %p1092_p8 }
  0x1e   : > { %p1095_p11 = pneg %p1094_p10 }
  0x20   : > { %p1100_p13 = pnand %p1098_p12, %p1095_p11 }
  0x22   : > { %1103 = shalt.err (!%p1100_p13)
}
  0x23   : > { %s1104_s10 = scalar_lea.vmem %s288_s20, 512  ;;  %p1112_p6 = scmp.lt.s32.totalorder %s288_s20, %s288_s20 }
  0x24   : > { %p1105_p0 = scmp.ne.s32.totalorder %s288_s20, %s1104_s10  ;;  %p1113_p1 = scmp.lt.s32.totalorder %s1104_s10, %s1104_s10 }
  0x26   : > { %p1107_p2 = pnand %p1105_p0, %p1093_p9  ;;  %p1114_p4 = por %p1113_p1, %p1112_p6 }
  0x28   : > { %p1108_p3 = pneg %p1107_p2 }
  0x2a   : > { %p1115_p5 = pnand %p1114_p4, %p1108_p3 }
  0x2c   : > { %1118 = shalt.err (!%p1115_p5)
}
  0x2d   : > { %1002 = dma.hbm_to_vmem [thread:$0]  (!%p1383_p7), %s1658_s2, 512, %s288_s20, [#allocation8]  }
  0x2e   : > { %s1659_s4 = sld [smem:[#allocation18_spill]] }
  0x34   : > { %s1119_s25 = scalar_lea.hbm %s1659_s4, 512 }
  0x35   : > { %p1120_p8 = scmp.ne.s32.totalorder %s1659_s4, %s1119_s25  ;;  %p1126_p5 = scmp.lt.u32.totalorder %s1119_s25, %s1659_s4 }
  0x37   : > { %p1122_p1 = pnand %p1120_p8, %p1093_p9 }
  0x39   : > { %p1123_p4 = pneg %p1122_p1 }
  0x3b   : > { %p1128_p10 = pnand %p1126_p5, %p1123_p4 }
  0x3d   : > { %1131 = shalt.err (!%p1128_p10)
}
  0x3e   : > { %s1132_s20 = scalar_lea.vmem %s1387_s22, 512  ;;  %p1140_p0 = scmp.lt.s32.totalorder %s1387_s22, %s1387_s22 }
  0x3f   : > { %p1133_p11 = scmp.ne.s32.totalorder %s1387_s22, %s1132_s20  ;;  %p1141_p2 = scmp.lt.s32.totalorder %s1132_s20, %s1132_s20 }
  0x41   : > { %p1135_p12 = pnand %p1133_p11, %p1093_p9  ;;  %p1142_p3 = por %p1141_p2, %p1140_p0 }
  0x43   : > { %p1136_p13 = pneg %p1135_p12 }
  0x45   : > { %p1143_p6 = pnand %p1142_p3, %p1136_p13 }
  0x47   : > { %1146 = shalt.err (!%p1143_p6)
}
  0x48   : > { %1005 = dma.hbm_to_vmem [thread:$0]  (!%p1383_p7), %s1659_s4, 512, %s1387_s22, [#allocation11]  }
  0x49   : > { %s40_s6 = sadd.s32 1, %s1265_s14  ;;  %s49_s19 = sadd.s32 1, %s1257_s12 }
  0x4a   : > { %p42_p9 = scmp.ge.s32.totalorder %s40_s6, 2  ;;  %p56_p8 = scmp.ne.s32.totalorder %s1257_s12, %s1253_s11 }
  0x4b   : > { %p57_p1 = scmp.eq.s32.totalorder %s1269_s15, 0  ;;  %p1015_p4 = scmp.lt.s32.totalorder %s1269_s15, 2 }
  0x4c   : > { %s1673_s6 = smov (%p42_p9, %s40_s6), 0  ;;  %s324_s23 = sand.u32 1, %s1257_s12  }
  0x4d   : > { %1660 = sst [smem:[#allocation16_spill]] %s1673_s6  ;;  %p58_p5 = por %p57_p1, %p56_p8 }
  0x4e   : > { %s44_s21 = ssub.s32 %s1265_s14, %s1673_s6  ;;  %s1447_s24 = sshll.u32 %s324_s23, 3 }
  0x4f   : > { %p47_p10 = scmp.eq.s32.totalorder %s44_s21, 0  ;;  %s985_s25 = sshll.u32 %s1265_s14, 7 }
  0x50   : > { %s1456_s28 = scalar_lea.hbm %s1636_s0, %s985_s25  ;;  %s328_s29 = scalar_lea.vmem [#allocation5], %s1447_s24 }
  0x51   : > { %s1451_s22 = scalar_select %p47_p10, %s1257_s12, %s49_s19  }
  0x52   : > { %s338_s20 = sshll.u32 %s328_s29, 4  ;;  %p1463_p7 = pnand %p1015_p4, %p58_p5  ;;  %s1459_s20 = int_to_ptr.vmem [resolvable:$true] %s338_s20 }
  0x53   : > { %s1470_s21 = scalar_lea.hbm %s1637_s1, %s985_s25  ;;  %s345_s26 = sand.u32 1, %s1269_s15  }
  0x54   : > { %s325_s27 = scalar_lea.sflag [#allocation6], %s324_s23  ;;  %s1147_s8 = scalar_lea.hbm %s1456_s28, 128 }
  0x55   : > { %p1148_p11 = scmp.ne.s32.totalorder %s1456_s28, %s1147_s8  ;;  %p1149_p12 = pneg %p1463_p7 }
  0x56   : > { %s1152_s4 = scalar_lea.hbm %s1636_s0, 256  ;;  %p1153_p2 = scmp.lt.u32.totalorder %s1456_s28, %s1636_s0 }
  0x57   : > { %p1150_p13 = pnand %p1149_p12, %p1148_p11  ;;  %p1154_p3 = scmp.lt.u32.totalorder %s1152_s4, %s1147_s8 }
  0x58   : > { %p1156_p9 = scmp.lt.u32.totalorder %s1147_s8, %s1456_s28 }
  0x59   : > { %p1151_p0 = pneg %p1150_p13  ;;  %p1155_p6 = por %p1154_p3, %p1153_p2 }
  0x5b   : > { %p1157_p8 = por %p1156_p9, %p1155_p6 }
  0x5d   : > { %p1158_p1 = pnand %p1157_p8, %p1151_p0 }
  0x5f   : > { %1161 = shalt.err (!%p1158_p1)
}
  0x60   : > { %s1162_s23 = scalar_lea.vmem %s1459_s20, 128  ;;  %s1273_s2 = smov [#allocation5]  }
  0x61   : > { %p1163_p4 = scmp.ne.s32.totalorder %s1459_s20, %s1162_s23  ;;  %s1167_s25 = sshll.u32 %s1273_s2, 4  ;;  %s1168_s25 = int_to_ptr.vmem [resolvable:$false] %s1167_s25 }
  0x62   : > { %s1169_s6 = scalar_lea.vmem %s1168_s25, 256  ;;  %p1170_p11 = scmp.lt.s32.totalorder %s1459_s20, %s1168_s25 }
  0x63   : > { %p1165_p5 = pnand %p1163_p4, %p1149_p12  ;;  %p1171_p13 = scmp.lt.s32.totalorder %s1169_s6, %s1162_s23 }
  0x65   : > { %p1166_p10 = pneg %p1165_p5  ;;  %p1172_p2 = por %p1171_p13, %p1170_p11 }
  0x67   : > { %p1173_p3 = pnand %p1172_p2, %p1166_p10 }
  0x69   : > { %1176 = shalt.err (!%p1173_p3)
}
  0x6a   : > { %1009 = dma.hbm_to_vmem [thread:$0]  (!%p1463_p7), %s1456_s28, 128, %s1459_s20, %s325_s27  }
  0x6b   : > { %s349_s4 = scalar_lea.vmem [#allocation7], %s1447_s24  ;;  %s346_s19 = scalar_lea.sflag [#allocation8], %s345_s26 }
  0x6c   : > { %s359_s8 = sshll.u32 %s349_s4, 4  ;;  %s1177_s29 = scalar_lea.hbm %s1470_s21, 128  ;;  %s360_s8 = int_to_ptr.vmem [resolvable:$true] %s359_s8 }
  0x6d   : > { %p1178_p0 = scmp.ne.s32.totalorder %s1470_s21, %s1177_s29  ;;  %s1182_s2 = scalar_lea.hbm %s1637_s1, 256 }
  0x6e   : > { %p1183_p8 = scmp.lt.u32.totalorder %s1470_s21, %s1637_s1  ;;  %p1184_p1 = scmp.lt.u32.totalorder %s1182_s2, %s1177_s29 }
  0x6f   : > { %p1180_p6 = pnand %p1178_p0, %p1149_p12  ;;  %p1186_p5 = scmp.lt.u32.totalorder %s1177_s29, %s1470_s21 }
  0x70   : > { %p1185_p4 = por %p1184_p1, %p1183_p8 }
  0x71   : > { %p1181_p9 = pneg %p1180_p6 }
  0x72   : > { %p1187_p10 = por %p1186_p5, %p1185_p4 }
  0x74   : > { %p1188_p11 = pnand %p1187_p10, %p1181_p9 }
  0x76   : > { %1191 = shalt.err (!%p1188_p11)
}
  0x77   : > { %s1192_s24 = scalar_lea.vmem %s360_s8, 128  ;;  %s1274_s28 = smov [#allocation7]  }
  0x78   : > { %p1193_p13 = scmp.ne.s32.totalorder %s360_s8, %s1192_s24  ;;  %s1197_s20 = sshll.u32 %s1274_s28, 4  ;;  %s1198_s20 = int_to_ptr.vmem [resolvable:$false] %s1197_s20 }
  0x79   : > { %s1199_s26 = scalar_lea.vmem %s1198_s20, 256  ;;  %p1200_p0 = scmp.lt.s32.totalorder %s360_s8, %s1198_s20 }
  0x7a   : > { %p1195_p2 = pnand %p1193_p13, %p1149_p12  ;;  %p1201_p6 = scmp.lt.s32.totalorder %s1199_s26, %s1192_s24 }
  0x7c   : > { %p1196_p3 = pneg %p1195_p2  ;;  %p1202_p1 = por %p1201_p6, %p1200_p0 }
  0x7e   : > { %p1203_p8 = pnand %p1202_p1, %p1196_p3 }
  0x80   : > { %1206 = shalt.err (!%p1203_p8)
}
  0x81   : > { %1012 = dma.hbm_to_vmem [thread:$0]  (!%p1463_p7), %s1470_s21, 128, %s360_s8, %s346_s19  }
  0x82   : > { %p1662_p9 = scmp.ne.s32.totalorder %s1656_s18, 0 }
  0x83   : > { %s370_s27 = sand.u32 (!%p1662_p9), 1, %s1253_s11   ;;  %p1663_p12 = scmp.ne.s32.totalorder (!%p1662_p9), %s1655_s17, 0 }
  0x84   : > { %368 = sbr.rel (%p1662_p9) target bundleno = 719 (0x2cf), region = 56  ;;  %s977_s4 = sshll.u32 (!%p1662_p9), %s370_s27, 3 }
  0x85   : > { %s371_s29 = scalar_lea.sflag (!%p1662_p9), [#allocation6], %s370_s27  ;;  %s374_s10 = scalar_lea.vmem (!%p1662_p9), [#allocation5], %s977_s4 }
  0x8b   : > { %1232 = dma.done.wait (%p1663_p12), %s371_s29, 128  }
  0x8c   : > { %1234 = vsyncadd (%p1663_p12), %s371_s29, 4294967168  ;;  %s1664_s23 = sadd.s32 4294967295, %s1269_s15   ;;  %s383_s21 = scalar_lea.vmem [#allocation7], %s977_s4 }
  0x8d   : > { %s379_s30 = sand.u32 1, %s1664_s23  }
  0x8e   : > { %s380_s2 = scalar_lea.sflag [#allocation8], %s379_s30 }
  0x8f   : > { %1236 = dma.done.wait (%p1663_p12), %s380_s2, 128  }
  0x90   : > { %1238 = vsyncadd (%p1663_p12), %s380_s2, 4294967168  ;;  %p1665_p7 = scmp.ne.s32.totalorder %s1654_s16, 0 }
  0x92   : > { %1240 = dma.done.wait (%p1665_p7), [#allocation8], 512  }
  0x93   : > { %1242 = vsyncadd (%p1665_p7), [#allocation8], 4294966784 }
  0x94   : > { %1244 = dma.done.wait (%p1665_p7), [#allocation11], 512  }
  0x95   : > { %1246 = vsyncadd (%p1665_p7), [#allocation11], 4294966784  ;;  %vm438_vm0 = vcmask 3072   ;;  %v1275_v1 = vmov 0.0   ;;  %vm447_vm1 = vcmask 1043456   ;;  %v441_v2 = vld [vmem:[%s374_s10] sm:$0xff] }
  0x96   : > { %439 = vst.msk [vmem:[#allocation2] sm:$0xf] %vm438_vm0, %v1275_v1  ;;  %440 = vst.msk [vmem:[#allocation3] sm:$0xf] %vm438_vm0, %v1275_v1  ;;  %v442_v3 = vld [vmem:[%s383_s21] sm:$0xff]  ;;  %v445_v4 = vcombine.high %v441_v2, %v441_v2  ;;  %v448_v5 = vsel %vm447_vm1, %v441_v2, 0.0 }
  0x97   : > { %v458_v6 = vcombine.high %v442_v3, %v442_v3  ;;  %v460_v8 = vsel %vm447_vm1, %v442_v3, 0.0  ;;  %v1276_v12 = vmov 0   ;;  %v474_v23 = vld [vmem:[#allocation9] sm:$0xff]  ;;  %v475_v24 = vld [vmem:[#allocation9 + $0x8] sm:$0xff]  ;;  %v476_v25 = vld [vmem:[#allocation9 + $0x10] sm:$0xff]  ;;  %vm827_vm2 = vcmask 1040384  }
  0x98   : > { %v449_v7 = vsel %vm447_vm1, %v445_v4, 0.0  ;;  %1071 = vset.pattern.permute.xlu1 %v1276_v12  ;;  %1072 = vset.pattern.permute.xlu0 %v1276_v12  ;;  %v477_v26 = vld [vmem:[#allocation9 + $0x18] sm:$0xff]  ;;  %v487_v27 = vcombine.high %v474_v23, %v474_v23  ;;  %v488_v28 = vcombine.high %v475_v24, %v475_v24  ;;  %v489_v29 = vcombine.high %v476_v25, %v476_v25  ;;  %p431_p4 = scmp.lt.s32.totalorder %s1261_s13, 1 }
  0x99   : > { %v461_v9 = vsel %vm447_vm1, %v458_v6, 0.0  ;;  %v450_v10 = vadd.f32 %v449_v7, %v448_v5  ;;  %v490_v30 = vcombine.high %v477_v26, %v477_v26  ;;  %v503_v6 = vld [vmem:[#allocation10] sm:$0xff]  ;;  %v1277_v12 = vmov 1966171168  }
  0x9a   : > { %v462_v11 = vadd.f32 %v461_v9, %v460_v8  ;;  %s1675_s13 = smov (!%p431_p4, %s1261_s13), 1  ;;  %vm847_vm3 = vcmask 0  }
  0x9b   : > { %451 = vadd.xlane.f32.xlu0 %v450_v10  ;;  %s433_s28 = scalar_lea.vmem %s1645_s9, %s1675_s13 }
  0x9d   : > { %v443_v13 = vld [vmem:[#allocation2] sm:$0xf]  ;;  %v456_v16 = vld [vmem:[#allocation3] sm:$0xf] }
  0x9f   : > { %463 = vadd.xlane.f32.xlu0 %v462_v11  ;;  %v504_v11 = vld [vmem:[#allocation10 + $0x8] sm:$0xff] }
 0x128   : > { %v452_v14 = vpop.xlane.xlu0 %451 }
 0x129   : > { %v453_v15 = vadd.f32 %v452_v14, %v443_v13  ;;  %v1557_v13 = vunpack.c.l.s4 %v1277_v12  ;;  %v604_v14 = vlaneseq }
 0x12b   : > { %455 = vst.msk [vmem:[#allocation2] sm:$0xf] %vm438_vm0, %v453_v15 }
 0x12c   : > { %v464_v17 = vpop.xlane.xlu0 %463 }
 0x12d   : > { %v465_v18 = vadd.f32 %v464_v17, %v456_v16  ;;  %v505_v17 = vld [vmem:[#allocation10 + $0x10] sm:$0xff] }
 0x12f   : > { %466 = vst.msk [vmem:[#allocation3] sm:$0xf] %vm438_vm0, %v465_v18  ;;  %v516_v18 = vcombine.high %v503_v6, %v503_v6 }
 0x132   : > { %v470_v19 = vld [vmem:[#allocation2] sm:$0xf] }
 0x133   : > { %v471_v20 = vmul.f32 0.00390625, %v470_v19 }
 0x135   : > { %480 = vperm.xlu1 %1071, %v471_v20  }
 0x136   : > { %v472_v21 = vld [vmem:[#allocation3] sm:$0xf] }
 0x137   : > { %v473_v22 = vmul.f32 0.00390625, %v472_v21 }
 0x139   : > { %509 = vperm.xlu1 %1071, %v473_v22   ;;  %v506_v22 = vld [vmem:[#allocation10 + $0x18] sm:$0xff] }
 0x1b4   : > { %v481_v31 = vpop.permute.xlu1 %480 }
 0x1b5   : > { %v495_v32 = vmul.f32 %v481_v31, %v474_v23  ;;  %v496_v33 = vmul.f32 %v487_v27, %v481_v31  ;;  %v497_v34 = vmul.f32 %v481_v31, %v475_v24  ;;  %v498_v35 = vmul.f32 %v488_v28, %v481_v31 }
 0x1b6   : > { %v499_v36 = vmul.f32 %v481_v31, %v476_v25  ;;  %v500_v37 = vmul.f32 %v489_v29, %v481_v31  ;;  %v501_v38 = vmul.f32 %v481_v31, %v477_v26  ;;  %v502_v39 = vmul.f32 %v490_v30, %v481_v31 }
 0x1b7   : > { %v533_v40 = vsel %vm447_vm1, %v495_v32, 0.0  ;;  %v540_v41 = vsel %vm447_vm1, %v496_v33, 0.0  ;;  %v547_v42 = vsel %vm447_vm1, %v497_v34, 0.0  ;;  %v554_v43 = vsel %vm447_vm1, %v498_v35, 0.0 }
 0x1b8   : > { %v534_v44 = vrot.slane %v533_v40, 4  ;;  %v541_v45 = vrot.slane %v540_v41, 4  ;;  %v548_v46 = vrot.slane %v547_v42, 4  ;;  %v555_v47 = vrot.slane %v554_v43, 4  ;;  %v510_v19 = vpop.permute.xlu1 %509 }
 0x1b9   : > { %v561_v48 = vsel %vm447_vm1, %v499_v36, 0.0  ;;  %v568_v49 = vsel %vm447_vm1, %v500_v37, 0.0  ;;  %v575_v50 = vsel %vm447_vm1, %v501_v38, 0.0  ;;  %v582_v51 = vsel %vm447_vm1, %v502_v39, 0.0 }
 0x1ba   : > { %v535_v52 = vadd.f32 %v534_v44, %v533_v40  ;;  %v542_v53 = vadd.f32 %v541_v45, %v540_v41  ;;  %v549_v54 = vadd.f32 %v548_v46, %v547_v42  ;;  %v556_v55 = vadd.f32 %v555_v47, %v554_v43 }
 0x1bb   : > { %v562_v56 = vrot.slane %v561_v48, 4  ;;  %v569_v57 = vrot.slane %v568_v49, 4  ;;  %v576_v58 = vrot.slane %v575_v50, 4  ;;  %v583_v59 = vrot.slane %v582_v51, 4 }
 0x1bc   : > { %v536_v60 = vrot.slane %v535_v52, 2  ;;  %v543_v61 = vrot.slane %v542_v53, 2  ;;  %v550_v62 = vrot.slane %v549_v54, 2  ;;  %v557_v63 = vrot.slane %v556_v55, 2 }
 0x1bd   : > { %v563_v0 = vadd.f32 %v562_v56, %v561_v48  ;;  %v570_v1 = vadd.f32 %v569_v57, %v568_v49  ;;  %v577_v2 = vadd.f32 %v576_v58, %v575_v50  ;;  %v584_v3 = vadd.f32 %v583_v59, %v582_v51 }
 0x1be   : > { %v537_v4 = vadd.f32 %v536_v60, %v535_v52  ;;  %v544_v5 = vadd.f32 %v543_v61, %v542_v53  ;;  %v551_v7 = vadd.f32 %v550_v62, %v549_v54  ;;  %v558_v8 = vadd.f32 %v557_v63, %v556_v55 }
 0x1bf   : > { %v564_v9 = vrot.slane %v563_v0, 2  ;;  %v571_v10 = vrot.slane %v570_v1, 2  ;;  %v578_v15 = vrot.slane %v577_v2, 2  ;;  %v585_v16 = vrot.slane %v584_v3, 2 }
 0x1c0   : > { %v538_v20 = vrot.slane %v537_v4, 1  ;;  %v517_v23 = vcombine.high %v504_v11, %v504_v11  ;;  %v545_v24 = vrot.slane %v544_v5, 1  ;;  %v552_v25 = vrot.slane %v551_v7, 1 }
 0x1c1   : > { %v565_v21 = vadd.f32 %v564_v9, %v563_v0  ;;  %v559_v26 = vrot.slane %v558_v8, 1  ;;  %v572_v27 = vadd.f32 %v571_v10, %v570_v1  ;;  %v603_v28 = vunpack.c.0.s8 %v1557_v13 }
 0x1c2   : > { %v1560_v29 = vshrl.u32 %v604_v14, 7  ;;  %v518_v30 = vcombine.high %v505_v17, %v505_v17  ;;  %v524_v31 = vmul.f32 %v510_v19, %v503_v6  ;;  %v579_v32 = vadd.f32 %v578_v15, %v577_v2 }
 0x1c3   : > { %v586_v33 = vadd.f32 %v585_v16, %v584_v3  ;;  %v519_v34 = vcombine.high %v506_v22, %v506_v22  ;;  %v525_v35 = vmul.f32 %v516_v18, %v510_v19  ;;  %v1562_v36 = vadd.f32 %v538_v20, %v537_v4 }
 0x1c4   : > { %v566_v37 = vrot.slane %v565_v21, 1  ;;  %v526_v38 = vmul.f32 %v510_v19, %v504_v11  ;;  %v527_v39 = vmul.f32 %v517_v23, %v510_v19  ;;  %v1564_v40 = vadd.f32 %v545_v24, %v544_v5 }
 0x1c5   : > { %v1566_v41 = vadd.f32 %v552_v25, %v551_v7  ;;  %v1568_v42 = vadd.f32 %v559_v26, %v558_v8  ;;  %v573_v43 = vrot.slane %v572_v27, 1  ;;  %v528_v44 = vmul.f32 %v510_v19, %v505_v17 }
 0x1c6   : > { %v529_v45 = vmul.f32 %v518_v30, %v510_v19  ;;  %v530_v46 = vmul.f32 %v510_v19, %v506_v22  ;;  %v649_v47 = vsel %vm447_vm1, %v524_v31, 0.0  ;;  %v580_v48 = vrot.slane %v579_v32, 1 }
 0x1c7   : > { %v587_v49 = vrot.slane %v586_v33, 1  ;;  %v650_v50 = vrot.slane %v649_v47, 4  ;;  %v656_v51 = vsel %vm447_vm1, %v525_v35, 0.0  ;;  %v1572_v52 = vadd.f32 %v566_v37, %v565_v21 }
 0x1c8   : > { %v657_v53 = vrot.slane %v656_v51, 4  ;;  %v663_v54 = vsel %vm447_vm1, %v526_v38, 0.0  ;;  %v670_v55 = vsel %vm447_vm1, %v527_v39, 0.0  ;;  %v574_v56 = vadd.f32 %v573_v43, %v572_v27 }
 0x1c9   : > { %v651_v57 = vadd.f32 %v650_v50, %v649_v47  ;;  %v664_v58 = vrot.slane %v663_v54, 4  ;;  %v671_v59 = vrot.slane %v670_v55, 4  ;;  %v677_v61 = vsel %vm447_vm1, %v528_v44, 0.0 }
 0x1ca   : > { %v658_v60 = vadd.f32 %v657_v53, %v656_v51  ;;  %v684_v62 = vsel %vm447_vm1, %v529_v45, 0.0  ;;  %v691_v63 = vsel %vm447_vm1, %v530_v46, 0.0  ;;  %v581_v0 = vadd.f32 %v580_v48, %v579_v32 }
 0x1cb   : > { %v652_v1 = vrot.slane %v651_v57, 2  ;;  %v665_v2 = vadd.f32 %v664_v58, %v663_v54  ;;  %v672_v3 = vadd.f32 %v671_v59, %v670_v55  ;;  %v678_v5 = vrot.slane %v677_v61, 4 }
 0x1cc   : > { %v659_v4 = vrot.slane %v658_v60, 2  ;;  %v685_v6 = vrot.slane %v684_v62, 4  ;;  %v692_v7 = vrot.slane %v691_v63, 4  ;;  %v531_v8 = vmul.f32 %v519_v34, %v510_v19 }
 0x1cd   : > { %v653_v9 = vadd.f32 %v652_v1, %v651_v57  ;;  %v666_v10 = vrot.slane %v665_v2, 2  ;;  %v673_v11 = vrot.slane %v672_v3, 2  ;;  %v679_v14 = vadd.f32 %v678_v5, %v677_v61 }
 0x1ce   : > { %v660_v12 = vadd.f32 %v659_v4, %v658_v60  ;;  %v686_v15 = vadd.f32 %v685_v6, %v684_v62  ;;  %v693_v16 = vadd.f32 %v692_v7, %v691_v63  ;;  %v588_v17 = vadd.f32 %v587_v49, %v586_v33 }
 0x1cf   : > { %v654_v18 = vrot.slane %v653_v9, 1  ;;  %v667_v20 = vadd.f32 %v666_v10, %v665_v2  ;;  %v674_v21 = vadd.f32 %v673_v11, %v672_v3  ;;  %v680_v23 = vrot.slane %v679_v14, 2  ;;  %v648_v10 = vld [vmem:[%s1641_s5] sm:$0xff] }
 0x1d0   : > { %v661_v22 = vrot.slane %v660_v12, 1  ;;  %v687_v24 = vrot.slane %v686_v15, 2  ;;  %v694_v25 = vrot.slane %v693_v16, 2  ;;  %v698_v19 = vsel %vm447_vm1, %v531_v8, 0.0 }
 0x1d1   : > { %v655_v26 = vadd.f32 %v654_v18, %v653_v9  ;;  %v668_v27 = vrot.slane %v667_v20, 1  ;;  %v675_v30 = vrot.slane %v674_v21, 1  ;;  %v681_v32 = vadd.f32 %v680_v23, %v679_v14  ;;  %v532_v9 = vld [vmem:[%s1639_s3] sm:$0xff] }
 0x1d2   : > { %v662_v31 = vadd.f32 %v661_v22, %v660_v12  ;;  %v688_v34 = vadd.f32 %v687_v24, %v686_v15  ;;  %v695_v35 = vadd.f32 %v694_v25, %v693_v16  ;;  %v699_v39 = vrot.slane %v698_v19, 4 }
 0x1d3   : > { %v669_v37 = vadd.f32 %v668_v27, %v667_v20  ;;  %v676_v38 = vadd.f32 %v675_v30, %v674_v21  ;;  %v606_v33 = vsub.s32 %v603_v28, %v1560_v29  ;;  %v597_v43 = vcombine.low %v1562_v36, %v1564_v40 }
 0x1d4   : > { %v682_v44 = vrot.slane %v681_v32, 1  ;;  %v689_v45 = vrot.slane %v688_v34, 1  ;;  %v598_v46 = vcombine.low %v1566_v41, %v1568_v42  ;;  %v599_v47 = vcombine.low %v1572_v52, %v574_v56 }
 0x1d5   : > { %v600_v48 = vcombine.low %v581_v0, %v588_v17  ;;  %v700_v49 = vadd.f32 %v699_v39, %v698_v19  ;;  %v696_v50 = vrot.slane %v695_v35, 1  ;;  %v713_v51 = vcombine.low %v655_v26, %v662_v31 }
 0x1d6   : > { %v683_v53 = vadd.f32 %v682_v44, %v681_v32  ;;  %v690_v54 = vadd.f32 %v689_v45, %v688_v34  ;;  %v714_v57 = vcombine.low %v669_v37, %v676_v38  ;;  %v607_v13 = vrot.slane %v597_v43, %v606_v33  ;;  %v784_v32 = vld [vmem:[%s1643_s7] sm:$0xff] }
 0x1d7   : > { %v701_v55 = vrot.slane %v700_v49, 2  ;;  %v614_v28 = vrot.slane %v598_v46, %v606_v33  ;;  %v621_v58 = vrot.slane %v599_v47, %v606_v33  ;;  %v628_v59 = vrot.slane %v600_v48, %v606_v33 }
 0x1d8   : > { %v697_v40 = vadd.f32 %v696_v50, %v695_v35  ;;  %v715_v61 = vcombine.low %v683_v53, %v690_v54  ;;  %v723_v62 = vrot.slane %v713_v51, %v606_v33  ;;  %v730_v41 = vrot.slane %v714_v57, %v606_v33 }
 0x1d9   : > { %v702_v36 = vadd.f32 %v701_v55, %v700_v49  ;;  %v629_v42 = vcombine.low %v607_v13, %v614_v28  ;;  %v630_v52 = vcombine.low %v621_v58, %v628_v59  ;;  %v789_v35 = vsub.s32 0, %v1560_v29 }
 0x1da   : > { %v737_v0 = vrot.slane %v715_v61, %v606_v33  ;;  %v745_v1 = vcombine.low %v723_v62, %v730_v41  ;;  %v793_v37 = vsub.s32 1, %v1560_v29  ;;  %v797_v38 = vsub.s32 2, %v1560_v29 }
 0x1db   : > { %v703_v60 = vrot.slane %v702_v36, 1  ;;  %v637_v2 = vrot.slane %v629_v42, %v606_v33  ;;  %v644_v3 = vrot.slane %v630_v52, %v606_v33  ;;  %v805_v46 = vsub.s32 4, %v1560_v29 }
 0x1dc   : > { %v753_v6 = vrot.slane %v745_v1, %v606_v33  ;;  %v809_v48 = vsub.s32 5, %v1560_v29  ;;  %v813_v54 = vsub.s32 6, %v1560_v29  ;;  %v817_v28 = vsub.s32 7, %v1560_v29 }
 0x1dd   : > { %v704_v56 = vadd.f32 %v703_v60, %v702_v36  ;;  %v645_v7 = vcombine.low %v637_v2, %v644_v3 }
 0x1df   : > { %v716_v63 = vcombine.low %v697_v40, %v704_v56  ;;  %v647_v12 = vadd.f32 %v645_v7, %v532_v9 }
 0x1e1   : > { %v744_v4 = vrot.slane %v716_v63, %v606_v33 }
 0x1e3   : > { %v746_v5 = vcombine.low %v737_v0, %v744_v4 }
 0x1e5   : > { %v760_v8 = vrot.slane %v746_v5, %v606_v33  ;;  %v801_v33 = vsub.s32 3, %v1560_v29  ;;  %v845_v29 = vld [vmem:[#allocation4] sm:$0x1] }
 0x1e7   : > { %v761_v11 = vcombine.low %v753_v6, %v760_v8 }
 0x1e9   : > { %v763_v14 = vadd.f32 %v761_v11, %v648_v10 }
 0x1eb   : > { %v764_v15 = vmul.f32 %v763_v14, %v647_v12 }
 0x1ed   : > { %v981_v16 = vmul.f32 -1.442695, %v764_v15 }
 0x1ef   : > { %1083 = vpow2.f32 %v981_v16 }
 0x1f9   : > { %v1084_v17 = vpop.eup %1083 }
 0x1fa   : > { %v768_v18 = vadd.f32 1.0, %v1084_v17 }
 0x1fc   : > { %1085 = vrcp.f32 %v768_v18 }
 0x206   : > { %v1086_v20 = vpop.eup %1085 }
 0x207   : > { %v771_v21 = vadd.f32 1.0, %v1086_v20 }
 0x209   : > { %v772_v22 = vmul.f32 %v771_v21, %v763_v14 }
 0x20b   : > { %v773_v23 = vadd.f32 %v772_v22, %v647_v12  ;;  %v774_v24 = vadd.f32 %v772_v22, %v763_v14 }
 0x20d   : > { %v775_v25 = vmul.f32 %v774_v24, %v773_v23  ;;  %v782_v19 = vadd.f32 %v774_v24, %v773_v23 }
 0x20f   : > { %v982_v26 = vmul.f32 -1.442695, %v775_v25 }
 0x211   : > { %1087 = vpow2.f32 %v982_v26 }
 0x21b   : > { %v1088_v27 = vpop.eup %1087 }
 0x21c   : > { %v779_v30 = vadd.f32 1.0, %v1088_v27 }
 0x21e   : > { %1089 = vrcp.f32 %v779_v30 }
 0x228   : > { %v1090_v31 = vpop.eup %1089 }
 0x229   : > { %v783_v34 = vmul.f32 %v1090_v31, %v782_v19 }
 0x22b   : > { %v785_v39 = vmul.f32 %v784_v32, %v783_v34 }
 0x22d   : > { %v790_v43 = vrot.slane %v785_v39, %v789_v35  ;;  %v794_v44 = vrot.slane %v785_v39, %v793_v37  ;;  %v798_v45 = vrot.slane %v785_v39, %v797_v38  ;;  %v802_v47 = vrot.slane %v785_v39, %v801_v33 }
 0x22e   : > { %v806_v53 = vrot.slane %v785_v39, %v805_v46  ;;  %v810_v13 = vrot.slane %v785_v39, %v809_v48  ;;  %v814_v36 = vrot.slane %v785_v39, %v813_v54  ;;  %v818_v61 = vrot.slane %v785_v39, %v817_v28 }
 0x22f   : > { %v828_v49 = vsel %vm827_vm2, %v790_v43, 0.0  ;;  %v829_v50 = vsel %vm827_vm2, %v794_v44, 0.0  ;;  %v831_v55 = vsel %vm827_vm2, %v798_v45, 0.0  ;;  %v833_v58 = vsel %vm827_vm2, %v802_v47, 0.0 }
 0x230   : > { %v830_v51 = vadd.f32 %v829_v50, %v828_v49  ;;  %v835_v40 = vsel %vm827_vm2, %v806_v53, 0.0  ;;  %v837_v62 = vsel %vm827_vm2, %v810_v13, 0.0  ;;  %v839_v42 = vsel %vm827_vm2, %v814_v36, 0.0 }
 0x231   : > { %v841_v56 = vsel %vm827_vm2, %v818_v61, 0.0 }
 0x232   : > { %v832_v57 = vadd.f32 %v831_v55, %v830_v51 }
 0x234   : > { %v834_v59 = vadd.f32 %v833_v58, %v832_v57 }
 0x236   : > { %v836_v60 = vadd.f32 %v835_v40, %v834_v59 }
 0x238   : > { %v838_v41 = vadd.f32 %v837_v62, %v836_v60 }
 0x23a   : > { %v840_v52 = vadd.f32 %v839_v42, %v838_v41 }
 0x23c   : > { %v842_v63 = vadd.f32 %v841_v56, %v840_v52 }
 0x23e   : > { %843 = vadd.xlane.f32.xlu0 %v842_v63 }
 0x2cb   : > { %v844_v0 = vpop.xlane.xlu0 %843 }
 0x2cc   : > { %v846_v1 = vadd.f32 %v845_v29, %v844_v0 }
 0x2ce   : > { %848 = vst.msk [vmem:[%s433_s28] sm:$0x1] %vm847_vm3, %v846_v1 }
 0x2cf PF: > { %s28_s15 = sadd.s32 1, %s1269_s15   ;;  %s1666_s20 = sld [smem:[#allocation16_spill]] }
 0x2d0   : > { %p25_p5 = scmp.ge.s32.totalorder %s28_s15, 4   ;;  %s1667_s6 = smov %s1253_s11 }
 0x2d1   : > { %s1668_s11 = smov %s1257_s12  ;;  %s1669_s12 = smov %s1451_s22 }
 0x2d2   : > { %s1670_s13 = smov %s1265_s14  ;;  %27 = sbr.rel (!%p25_p5) target bundleno = 10 (0xa), region = 125 }
 0x2d5   : > { %s1671_s14 = smov %s1666_s20 }
 0x2d9   :  { %866 = vsyncpa [#allocation6], 1 }
 0x2da   :  { %868 = vsyncpa [#allocation6 + $0x1], 1 }
 0x2db   :  { %869 = vsyncpa [#allocation8], 1 }
 0x2dc   :  { %871 = vsyncpa [#allocation8 + $0x1], 1 }
 0x2dd   :  { %872 = vsyncpa [#allocation11], 1 }

</bundles_post_ra>
